<compile_context>
chip_gen: v7x
topology: tpu7x:2x2x1
jax: 0.10.0
libtpu: 0.0.40
codegen_flags: <defaults>
</compile_context>

<pallas_src>
import jax
import jax.numpy as jnp
from jax import lax
from jax.experimental import pallas as pl
from jax.experimental.pallas import tpu as pltpu


_VMEM_LIMIT_BYTES = 64 * 1024 * 1024  # fits v7x physical VMEM, lifts v5e default


def _round_up(x, m):
    return (x + m - 1) // m * m


# ----------------------------------------------------------------------------
# Parameter preparation (done once at init time, NOT per forward call).
# ----------------------------------------------------------------------------
def init_decoder_rnn_params(w_ih, w_hh, b_ih, b_hh):
    """Prepare GRUCell parameters from PyTorch layout.

    w_ih: (3H, input_size)  rows ordered [r | z | n]
    w_hh: (3H, hidden_size)
    b_ih, b_hh: (3H,)
    """
    three_h, _ = w_ih.shape
    H = three_h // 3
    Hp = _round_up(H, 128)  # lane-aligned gate width

    def pad_gate_cols(w_t):
        # w_t: (rows, 3H) -> (rows, 3*Hp) with each gate padded to Hp columns.
        rows = w_t.shape[0]
        w3 = w_t.reshape(rows, 3, H)
        w3 = jnp.pad(w3, ((0, 0), (0, 0), (0, Hp - H)))
        return w3.reshape(rows, 3 * Hp)

    w_x = pad_gate_cols(jnp.transpose(w_ih))             # (IN, 3Hp)  [i_r|i_z|i_n]
    w_h = pad_gate_cols(jnp.transpose(w_hh))              # (H,  3Hp)  [h_r|h_z|h_n]
    w_h = jnp.pad(w_h, ((0, Hp - H), (0, 0)))             # (Hp, 3Hp)  zero rows for padded h lanes

    b_i3 = jnp.pad(b_ih.reshape(3, H), ((0, 0), (0, Hp - H)))  # (3, Hp)
    b_h3 = jnp.pad(b_hh.reshape(3, H), ((0, 0), (0, Hp - H)))  # (3, Hp)
    # r/z biases pre-summed; n-gate input bias kept with the input projection,
    # n-gate hidden bias kept separate (exact PyTorch n-gate formulation).
    b_x = jnp.concatenate(
        [b_i3[0] + b_h3[0], b_i3[1] + b_h3[1], b_i3[2]]).reshape(1, 3 * Hp)
    b_hn = b_h3[2].reshape(1, Hp)

    return dict(
        w_x=w_x.astype(jnp.bfloat16),    # MXU operand: bf16
        w_h=w_h.astype(jnp.bfloat16),    # MXU operand: bf16
        b_x=b_x.astype(jnp.float32),
        b_hn=b_hn.astype(jnp.float32),
        hidden_size=H,
        hidden_pad=Hp,
    )


# ----------------------------------------------------------------------------
# Single-step GRUCell kernel (== DecoderRNN.forward).
#   NOTE: for multi-step decode use decoder_rnn_decode; this path re-DMAs the
#   weights HBM->VMEM on every call and should only be used for genuinely
#   single-step inference.
# ----------------------------------------------------------------------------
def gru_cell_kernel(x_ref, h_ref, wx_ref, wh_ref, bx_ref, bhn_ref, out_ref):
    Hp = out_ref.shape[-1]
    h = h_ref[...].astype(jnp.float32)

    gi = jnp.dot(x_ref[...].astype(jnp.bfloat16), wx_ref[...],
                 preferred_element_type=jnp.float32) + bx_ref[...]
    gh = jnp.dot(h.astype(jnp.bfloat16), wh_ref[...],
                 preferred_element_type=jnp.float32)

    # Lane-aligned gate slices (each gate is Hp = multiple of 128 lanes).
    r = jax.nn.sigmoid(gi[:, 0:Hp] + gh[:, 0:Hp])
    z = jax.nn.sigmoid(gi[:, Hp:2 * Hp] + gh[:, Hp:2 * Hp])
    n = jnp.tanh(gi[:, 2 * Hp:3 * Hp] + r * (gh[:, 2 * Hp:3 * Hp] + bhn_ref[...]))

    out_ref[...] = ((1.0 - z) * n + z * h).astype(out_ref.dtype)


def decoder_rnn_forward(x, hidden, params):
    """One GRUCell step: x (B, input_size), hidden (B, H) -> h' (B, H)."""
    B = x.shape[0]
    H, Hp = params["hidden_size"], params["hidden_pad"]
    Bp = _round_up(max(B, 8), 8)  # sublane-aligned batch

    x_p = jnp.pad(x, ((0, Bp - B), (0, 0)))
    h_p = jnp.pad(hidden, ((0, Bp - B), (0, Hp - H)))
    bhn_b = jnp.broadcast_to(params["b_hn"], (Bp, Hp))

    vmem = pl.BlockSpec(memory_space=pltpu.MemorySpace.VMEM)
    h_new = pl.pallas_call(
        gru_cell_kernel,
        out_shape=jax.ShapeDtypeStruct((Bp, Hp), x.dtype),
        in_specs=[vmem] * 6,
        out_specs=vmem,
        compiler_params=pltpu.CompilerParams(
            vmem_limit_bytes=_VMEM_LIMIT_BYTES),
    )(x_p, h_p, params["w_x"], params["w_h"], params["b_x"], bhn_b)
    return h_new[:B, :H]


# ----------------------------------------------------------------------------
# Fused multi-step decode: one pallas_call over the whole sequence.
#   - time is a chunked, sequential grid axis ("arbitrary")
#   - hidden state lives in a f32 VMEM scratch across grid steps
#   - W_hh / b_hn / h0 BlockSpecs return the same block every step -> resident
#     (single-buffered, since they are never re-fetched)
#   - the input projection is hoisted out of the recurrence as one big matmul
# ----------------------------------------------------------------------------
def gru_seq_kernel(gi_ref, wh_ref, bhn_ref, h0_ref, hseq_ref, h_state):
    @pl.when(pl.program_id(0) == 0)
    def _():
        h_state[...] = h0_ref[...].astype(jnp.float32)

    TC = gi_ref.shape[0]
    Hp = h_state.shape[-1]
    wh = wh_ref[...]      # (Hp, 3Hp) bf16, resident across the whole grid
    bhn = bhn_ref[...]    # (Bp, Hp)  f32, resident

    def step(t, h):
        gi = gi_ref[t].astype(jnp.float32)  # (Bp, 3Hp): includes fused biases
        gh = jnp.dot(h.astype(jnp.bfloat16), wh,
                     preferred_element_type=jnp.float32)
        r = jax.nn.sigmoid(gi[:, 0:Hp] + gh[:, 0:Hp])
        z = jax.nn.sigmoid(gi[:, Hp:2 * Hp] + gh[:, Hp:2 * Hp])
        n = jnp.tanh(gi[:, 2 * Hp:3 * Hp] + r * (gh[:, 2 * Hp:3 * Hp] + bhn))
        h_new = (1.0 - z) * n + z * h
        hseq_ref[t] = h_new.astype(hseq_ref.dtype)
        return h_new

    h_state[...] = lax.fori_loop(0, TC, step, h_state[...], unroll=True)


def _decode_pallas_call(TC, Bp, Hp, n_chunks, out_dtype, single_buffer):
    resident = dict(pipeline_mode=pl.Buffered(1)) if single_buffer else {}
    grid_spec = pltpu.PrefetchScalarGridSpec(
        num_scalar_prefetch=0,
        grid=(n_chunks,),
        in_specs=[
            pl.BlockSpec((TC, Bp, 3 * Hp), lambda c: (c, 0, 0)),      # gi chunk
            pl.BlockSpec((Hp, 3 * Hp), lambda c: (0, 0), **resident),  # W_hh
            pl.BlockSpec((Bp, Hp), lambda c: (0, 0), **resident),      # b_hn
            pl.BlockSpec((Bp, Hp), lambda c: (0, 0), **resident),      # h0
        ],
        out_specs=pl.BlockSpec((TC, Bp, Hp), lambda c: (c, 0, 0)),
        scratch_shapes=[pltpu.VMEM((Bp, Hp), jnp.float32)],             # hidden
    )
    return pl.pallas_call(
        gru_seq_kernel,
        out_shape=jax.ShapeDtypeStruct((n_chunks * TC, Bp, Hp), out_dtype),
        grid_spec=grid_spec,
        compiler_params=pltpu.CompilerParams(
            dimension_semantics=("arbitrary",),       # recurrence: sequential
            vmem_limit_bytes=_VMEM_LIMIT_BYTES),
    )


def decoder_rnn_decode(x_seq, h0, params, time_chunk=8):
    """Apply the GRUCell over a sequence: x_seq (T, B, in), h0 (B, H).

    Returns all hidden states (T, B, H); the final state is h_seq[-1].
    """
    T, B, _ = x_seq.shape
    H, Hp = params["hidden_size"], params["hidden_pad"]
    Bp = _round_up(max(B, 8), 8)
    TC = min(time_chunk, T)
    Tp = _round_up(T, TC)
    n_chunks = Tp // TC

    h0_p = jnp.pad(h0, ((0, Bp - B), (0, Hp - H)))
    x_p = jnp.pad(x_seq, ((0, Tp - T), (0, Bp - B), (0, 0)))

    # Hoisted input projection: no sequential dependence, so one big bf16
    # matmul over all T timesteps (plain XLA).  b_ir+b_hr, b_iz+b_hz, b_in
    # are already folded into b_x; the recurrent kernel only serializes the
    # h @ W_hh part.
    gi_seq = jnp.einsum(
        "tbi,ig->tbg", x_p.astype(jnp.bfloat16), params["w_x"],
        preferred_element_type=jnp.float32) + params["b_x"]

    bhn_b = jnp.broadcast_to(params["b_hn"], (Bp, Hp))

    try:
        call = _decode_pallas_call(TC, Bp, Hp, n_chunks, x_seq.dtype, True)
        h_seq = call(gi_seq, params["w_h"], bhn_b, h0_p)
    except Exception:
        # Fallback: some builds may reject single-buffered (Buffered(1)) blocks.
        call = _decode_pallas_call(TC, Bp, Hp, n_chunks, x_seq.dtype, False)
        h_seq = call(gi_seq, params["w_h"], bhn_b, h0_p)

    return h_seq[:T, :B, :H]


# ----------------------------------------------------------------------------
# Pure-JAX reference matching torch.nn.GRUCell (PyTorch weight layout, f32).
# ----------------------------------------------------------------------------
def _reference_gru_cell(x, hidden, w_ih, w_hh, b_ih, b_hh):
    H = hidden.shape[-1]
    gi = x @ w_ih.T + b_ih
    gh = hidden @ w_hh.T + b_hh
    i_r, i_z, i_n = gi[:, :H], gi[:, H:2 * H], gi[:, 2 * H:]
    h_r, h_z, h_n = gh[:, :H], gh[:, H:2 * H], gh[:, 2 * H:]
    r = jax.nn.sigmoid(i_r + h_r)
    z = jax.nn.sigmoid(i_z + h_z)
    n = jnp.tanh(i_n + r * h_n)
    return (1.0 - z) * n + z * hidden


if __name__ == "__main__":
    batch = 2
    input_size = 48
    hidden_size = 32
    seq_len = 8

    key = jax.random.PRNGKey(0)
    k_x, k_h, k_wih, k_whh, k_bih, k_bhh, k_seq = jax.random.split(key, 7)

    x = jax.random.normal(k_x, (batch, input_size), dtype=jnp.float32)
    hidden = jax.random.normal(k_h, (batch, hidden_size), dtype=jnp.float32)
    x_seq = jax.random.normal(k_seq, (seq_len, batch, input_size), dtype=jnp.float32)

    # Deterministic "init" mimicking nn.GRUCell parameter shapes (PyTorch layout).
    scale = 1.0 / jnp.sqrt(hidden_size)
    w_ih = jax.random.uniform(k_wih, (3 * hidden_size, input_size),
                              minval=-scale, maxval=scale, dtype=jnp.float32)
    w_hh = jax.random.uniform(k_whh, (3 * hidden_size, hidden_size),
                              minval=-scale, maxval=scale, dtype=jnp.float32)
    b_ih = jax.random.uniform(k_bih, (3 * hidden_size,),
                              minval=-scale, maxval=scale, dtype=jnp.float32)
    b_hh = jax.random.uniform(k_bhh, (3 * hidden_size,),
                              minval=-scale, maxval=scale, dtype=jnp.float32)

    # One-time parameter preparation (transpose / gate-pad / bias fuse / bf16).
    params = init_decoder_rnn_params(w_ih, w_hh, b_ih, b_hh)

    # bf16 matmul operands vs f32 reference -> loosened tolerance.
    TOL = 5e-2

    # --- Single step (== DecoderRNN.forward) ---------------------------------
    out = decoder_rnn_forward(x, hidden, params)
    out = jax.block_until_ready(out)
    ref = _reference_gru_cell(x, hidden, w_ih, w_hh, b_ih, b_hh)
    assert out.shape == (batch, hidden_size)
    assert jnp.allclose(out, ref, atol=TOL, rtol=TOL)

    # --- Fused multi-step decode (time loop in one pallas_call) --------------
    h_seq = decoder_rnn_decode(x_seq, hidden, params)
    h_seq = jax.block_until_ready(h_seq)

    h_ref = hidden
    ref_steps = []
    for t in range(seq_len):
        h_ref = _reference_gru_cell(x_seq[t], h_ref, w_ih, w_hh, b_ih, b_hh)
        ref_steps.append(h_ref)
    ref_seq = jnp.stack(ref_steps, axis=0)

    assert h_seq.shape == (seq_len, batch, hidden_size)
    assert jnp.allclose(h_seq, ref_seq, atol=TOL, rtol=TOL)

    print("KERNEL_OK")
</pallas_src>

<mosaic_0001>
module attributes {stable_mosaic.version = 11 : i64} {
  func.func @gru_cell_kernel(%arg0: memref<8x48xf32, #tpu.memory_space<vmem>>, %arg1: memref<8x128xf32, #tpu.memory_space<vmem>>, %arg2: memref<48x384xbf16, #tpu.memory_space<vmem>>, %arg3: memref<128x384xbf16, #tpu.memory_space<vmem>>, %arg4: memref<1x384xf32, #tpu.memory_space<vmem>>, %arg5: memref<8x128xf32, #tpu.memory_space<vmem>>, %arg6: memref<8x128xf32, #tpu.memory_space<vmem>>) attributes {dimension_semantics = [], scalar_prefetch = 0 : i64, scratch_operands = 0 : i64, tpu.core_type = #tpu.core_type<tc>} {
    %c0 = arith.constant 0 : index
    %c0_0 = arith.constant 0 : index
    %0 = vector.load %arg1[%c0, %c0_0] : memref<8x128xf32, #tpu.memory_space<vmem>>, vector<8x128xf32>
    %c0_1 = arith.constant 0 : index
    %c0_2 = arith.constant 0 : index
    %1 = vector.load %arg0[%c0_1, %c0_2] : memref<8x48xf32, #tpu.memory_space<vmem>>, vector<8x48xf32>
    %2 = arith.truncf %1 : vector<8x48xf32> to vector<8x48xbf16>
    %c0_3 = arith.constant 0 : index
    %c0_4 = arith.constant 0 : index
    %3 = vector.load %arg2[%c0_3, %c0_4] : memref<48x384xbf16, #tpu.memory_space<vmem>>, vector<48x384xbf16>
    %cst = arith.constant dense<0.000000e+00> : vector<8x384xf32>
    %4 = tpu.matmul %2, %3, %cst {dimension_numbers = #tpu.dot_dimension_numbers<[1], [0], [0], [1], [0, 0, 1, 1], [], []>} : vector<8x48xbf16>, vector<48x384xbf16>, vector<8x384xf32> -> vector<8x384xf32>
    %c0_5 = arith.constant 0 : index
    %c0_6 = arith.constant 0 : index
    %5 = vector.load %arg4[%c0_5, %c0_6] : memref<1x384xf32, #tpu.memory_space<vmem>>, vector<1x384xf32>
    %6 = vector.broadcast %5 : vector<1x384xf32> to vector<8x384xf32>
    %7 = arith.addf %4, %6 : vector<8x384xf32>
    %8 = arith.truncf %0 : vector<8x128xf32> to vector<8x128xbf16>
    %c0_7 = arith.constant 0 : index
    %c0_8 = arith.constant 0 : index
    %9 = vector.load %arg3[%c0_7, %c0_8] : memref<128x384xbf16, #tpu.memory_space<vmem>>, vector<128x384xbf16>
    %cst_9 = arith.constant dense<0.000000e+00> : vector<8x384xf32>
    %10 = tpu.matmul %8, %9, %cst_9 {dimension_numbers = #tpu.dot_dimension_numbers<[1], [0], [0], [1], [0, 0, 1, 1], [], []>} : vector<8x128xbf16>, vector<128x384xbf16>, vector<8x384xf32> -> vector<8x384xf32>
    %11 = vector.extract_strided_slice %7 {offsets = [0, 0], sizes = [8, 128], strides = [1, 1]} : vector<8x384xf32> to vector<8x128xf32>
    %12 = vector.extract_strided_slice %10 {offsets = [0, 0], sizes = [8, 128], strides = [1, 1]} : vector<8x384xf32> to vector<8x128xf32>
    %13 = arith.addf %11, %12 : vector<8x128xf32>
    %14 = arith.negf %13 : vector<8x128xf32>
    %15 = math.exp %14 : vector<8x128xf32>
    %cst_10 = arith.constant 1.000000e+00 : f32
    %16 = vector.broadcast %cst_10 : f32 to vector<8x128xf32>
    %17 = arith.addf %16, %15 : vector<8x128xf32>
    %18 = arith.divf %16, %17 : vector<8x128xf32>
    %19 = vector.extract_strided_slice %7 {offsets = [0, 128], sizes = [8, 128], strides = [1, 1]} : vector<8x384xf32> to vector<8x128xf32>
    %20 = vector.extract_strided_slice %10 {offsets = [0, 128], sizes = [8, 128], strides = [1, 1]} : vector<8x384xf32> to vector<8x128xf32>
    %21 = arith.addf %19, %20 : vector<8x128xf32>
    %22 = arith.negf %21 : vector<8x128xf32>
    %23 = math.exp %22 : vector<8x128xf32>
    %cst_11 = arith.constant 1.000000e+00 : f32
    %24 = vector.broadcast %cst_11 : f32 to vector<8x128xf32>
    %25 = arith.addf %24, %23 : vector<8x128xf32>
    %26 = arith.divf %24, %25 : vector<8x128xf32>
    %27 = vector.extract_strided_slice %7 {offsets = [0, 256], sizes = [8, 128], strides = [1, 1]} : vector<8x384xf32> to vector<8x128xf32>
    %28 = vector.extract_strided_slice %10 {offsets = [0, 256], sizes = [8, 128], strides = [1, 1]} : vector<8x384xf32> to vector<8x128xf32>
    %c0_12 = arith.constant 0 : index
    %c0_13 = arith.constant 0 : index
    %29 = vector.load %arg5[%c0_12, %c0_13] : memref<8x128xf32, #tpu.memory_space<vmem>>, vector<8x128xf32>
    %30 = arith.addf %28, %29 : vector<8x128xf32>
    %31 = arith.mulf %18, %30 : vector<8x128xf32>
    %32 = arith.addf %27, %31 : vector<8x128xf32>
    %33 = math.tanh %32 : vector<8x128xf32>
    %cst_14 = arith.constant 1.000000e+00 : f32
    %34 = vector.broadcast %cst_14 : f32 to vector<8x128xf32>
    %35 = arith.subf %34, %26 : vector<8x128xf32>
    %36 = arith.mulf %35, %33 : vector<8x128xf32>
    %37 = arith.mulf %26, %0 : vector<8x128xf32>
    %38 = arith.addf %36, %37 : vector<8x128xf32>
    %c0_15 = arith.constant 0 : index
    %c0_16 = arith.constant 0 : index
    %39 = vector.load %arg6[%c0_15, %c0_16] : memref<8x128xf32, #tpu.memory_space<vmem>>, vector<8x128xf32>
    tpu.vector_store %arg6[%c0_15, %c0_16], %38 {strides = array<i32>} : memref<8x128xf32, #tpu.memory_space<vmem>>, vector<8x128xf32>,
    return
  }
}

</mosaic_0001>

<bundles_post_ra>
// kernel: tpu_custom_call.1
= control target key start
LH: loop header
LB: loop body
LE: loop exit
PB: predicated region body
PF: predicated region fallthrough
CT: control target
= control target key end

     0   :  { %11 = vsyncpa [#allocation3], 0  ;;  %s1018_s0 = inlined_call_operand.hbm [shape: f32[8,48], index: 0, kind: input, shape index: {}]   ;;  %s1019_s1 = inlined_call_operand.hbm [shape: f32[8,128], index: 1, kind: input, shape index: {}]   ;;  %s1020_s2 = inlined_call_operand.hbm [shape: bf16[48,384], index: 2, kind: input, shape index: {}]   ;;  %s1021_s3 = inlined_call_operand.hbm [shape: bf16[128,384], index: 3, kind: input, shape index: {}]   ;;  %s1022_s4 = inlined_call_operand.hbm [shape: f32[1,384], index: 4, kind: input, shape index: {}]   ;;  %s1023_s5 = inlined_call_operand.hbm [shape: f32[8,128], index: 5, kind: input, shape index: {}]   ;;  %s1024_s6 = inlined_call_operand.hbm [shape: f32[8,128], index: 6, kind: output, shape index: {}]  }
   0x1   :  { %12 = vsyncpa [#allocation6], 0 }
   0x2   :  { %13 = vsyncpa [#allocation9], 0 }
   0x3   :  { %14 = vsyncpa [#allocation12], 0 }
   0x4   :  { %15 = vsyncpa [#allocation4], 0  ;;  %s864_s21 = smov [#allocation5]   ;;  %s700_s25 = scalar_lea.hbm %s1019_s1, 128 }
   0x5   :  { %s32_s22 = sshll.u32 %s864_s21, 4  ;;  %p701_p0 = scmp.ne.s32.totalorder %s1019_s1, %s700_s25  ;;  %s33_s22 = int_to_ptr.vmem [resolvable:$true] %s32_s22 }
   0x6   :  { %p704_p1 = scmp.lt.u32.totalorder %s700_s25, %s1019_s1 }
   0x8   :  { %p706_p2 = pnand %p704_p1, %p701_p0 }
   0xa   :  { %709 = shalt.err (!%p706_p2)
}
   0xb   :  { %s710_s30 = scalar_lea.vmem %s33_s22, 128  ;;  %p715_p4 = scmp.lt.s32.totalorder %s33_s22, %s33_s22 }
   0xc   :  { %p711_p3 = scmp.ne.s32.totalorder %s33_s22, %s710_s30  ;;  %p716_p5 = scmp.lt.s32.totalorder %s710_s30, %s710_s30 }
   0xe   :  { %p717_p6 = por %p716_p5, %p715_p4 }
  0x10   :  { %p718_p7 = pnand %p717_p6, %p711_p3 }
  0x12   :  { %721 = shalt.err (!%p718_p7)
}
  0x13   :  { %35 = dma.hbm_to_vmem [thread:$0]  %s1019_s1, 128, %s33_s22, [#allocation6]  }
  0x14   :  { %s865_s9 = smov [#allocation8]   ;;  %s866_s11 = smov [#allocation2]  }
  0x15   :  { %s53_s10 = sshll.u32 %s865_s9, 4  ;;  %s22_s12 = sshll.u32 %s866_s11, 4  ;;  %s54_s10 = int_to_ptr.vmem [resolvable:$true] %s53_s10  ;;  %s23_s12 = int_to_ptr.vmem [resolvable:$true] %s22_s12 }
  0x16   :  { %s722_s15 = scalar_lea.hbm %s1021_s3, 3072 }
  0x17   :  { %p723_p8 = scmp.ne.s32.totalorder %s1021_s3, %s722_s15  ;;  %p726_p9 = scmp.lt.u32.totalorder %s722_s15, %s1021_s3 }
  0x19   :  { %p728_p10 = pnand %p726_p9, %p723_p8 }
  0x1b   :  { %731 = shalt.err (!%p728_p10)
}
  0x1c   :  { %s732_s1 = scalar_lea.vmem %s54_s10, 3072  ;;  %p737_p12 = scmp.lt.s32.totalorder %s54_s10, %s54_s10 }
  0x1d   :  { %p733_p11 = scmp.ne.s32.totalorder %s54_s10, %s732_s1  ;;  %p738_p13 = scmp.lt.s32.totalorder %s732_s1, %s732_s1 }
  0x1f   :  { %p739_p0 = por %p738_p13, %p737_p12 }
  0x21   :  { %p740_p1 = pnand %p739_p0, %p733_p11 }
  0x23   :  { %743 = shalt.err (!%p740_p1)
}
  0x24   :  { %s867_s20 = smov 192   ;;  %s868_s21 = smov 12  }
  0x25   :  { %59 = dma.hbm_to_vmem [thread:$0]  %s1021_s3, 3072, %s54_s10, [#allocation9], %s867_s20, %s867_s20, %s868_s21  }
  0x26   :  { %s744_s26 = scalar_lea.hbm %s1018_s0, 128 }
  0x27   :  { %p745_p2 = scmp.ne.s32.totalorder %s1018_s0, %s744_s26  ;;  %p748_p3 = scmp.lt.u32.totalorder %s744_s26, %s1018_s0 }
  0x29   :  { %p750_p4 = pnand %p748_p3, %p745_p2 }
  0x2b   :  { %753 = shalt.err (!%p750_p4)
}
  0x2c   :  { %s754_s7 = scalar_lea.vmem %s23_s12, 128  ;;  %p759_p6 = scmp.lt.s32.totalorder %s23_s12, %s23_s12 }
  0x2d   :  { %p755_p5 = scmp.ne.s32.totalorder %s23_s12, %s754_s7  ;;  %p760_p7 = scmp.lt.s32.totalorder %s754_s7, %s754_s7 }
  0x2f   :  { %p761_p8 = por %p760_p7, %p759_p6 }
  0x31   :  { %p762_p9 = pnand %p761_p8, %p755_p5 }
  0x33   :  { %765 = shalt.err (!%p762_p9)
}
  0x34   :  { %25 = dma.hbm_to_vmem [thread:$0]  %s1018_s0, 128, %s23_s12, [#allocation3]  }
  0x35   :  { %s869_s9 = smov [#allocation7]   ;;  %s870_s11 = smov [#allocation10]  }
  0x36   :  { %s41_s10 = sshll.u32 %s869_s9, 4  ;;  %s66_s13 = sshll.u32 %s870_s11, 4  ;;  %s42_s10 = int_to_ptr.vmem [resolvable:$true] %s41_s10  ;;  %s67_s13 = int_to_ptr.vmem [resolvable:$true] %s66_s13 }
  0x37   :  { %s766_s16 = scalar_lea.hbm %s1020_s2, 1152 }
  0x38   :  { %p767_p10 = scmp.ne.s32.totalorder %s1020_s2, %s766_s16  ;;  %p770_p11 = scmp.lt.u32.totalorder %s766_s16, %s1020_s2 }
  0x3a   :  { %p772_p12 = pnand %p770_p11, %p767_p10 }
  0x3c   :  { %775 = shalt.err (!%p772_p12)
}
  0x3d   :  { %s776_s0 = scalar_lea.vmem %s42_s10, 1152  ;;  %p781_p0 = scmp.lt.s32.totalorder %s42_s10, %s42_s10 }
  0x3e   :  { %p777_p13 = scmp.ne.s32.totalorder %s42_s10, %s776_s0  ;;  %p782_p1 = scmp.lt.s32.totalorder %s776_s0, %s776_s0 }
  0x40   :  { %p783_p2 = por %p782_p1, %p781_p0 }
  0x42   :  { %p784_p3 = pnand %p783_p2, %p777_p13 }
  0x44   :  { %787 = shalt.err (!%p784_p3)
}
  0x45   :  { %47 = dma.hbm_to_vmem [thread:$0]  %s1020_s2, 1152, %s42_s10, [#allocation6], %s867_s20, %s867_s20, %s868_s21  }
  0x46   :  { %s788_s25 = scalar_lea.hbm %s1022_s4, 48 }
  0x47   :  { %p789_p4 = scmp.ne.s32.totalorder %s1022_s4, %s788_s25  ;;  %p792_p5 = scmp.lt.u32.totalorder %s788_s25, %s1022_s4 }
  0x49   :  { %p794_p6 = pnand %p792_p5, %p789_p4 }
  0x4b   :  { %797 = shalt.err (!%p794_p6)
}
  0x4c   :  { %s798_s30 = scalar_lea.vmem %s67_s13, 48  ;;  %s802_s7 = scalar_lea.vmem %s67_s13, 64 }
  0x4d   :  { %p799_p7 = scmp.ne.s32.totalorder %s67_s13, %s798_s30  ;;  %p803_p8 = scmp.lt.s32.totalorder %s67_s13, %s67_s13 }
  0x4e   :  { %p804_p9 = scmp.lt.s32.totalorder %s802_s7, %s798_s30 }
  0x50   :  { %p805_p10 = por %p804_p9, %p803_p8 }
  0x52   :  { %p806_p11 = pnand %p805_p10, %p799_p7 }
  0x54   :  { %809 = shalt.err (!%p806_p11)
}
  0x55   :  { %69 = dma.hbm_to_vmem [thread:$0]  %s1022_s4, 48, %s67_s13, [#allocation9]  }
  0x56   :  { %s871_s21 = smov [#allocation11]   ;;  %s810_s10 = scalar_lea.hbm %s1023_s5, 128 }
  0x57   :  { %s76_s3 = sshll.u32 %s871_s21, 4  ;;  %p811_p12 = scmp.ne.s32.totalorder %s1023_s5, %s810_s10  ;;  %s77_s3 = int_to_ptr.vmem [resolvable:$true] %s76_s3 }
  0x58   :  { %p814_p13 = scmp.lt.u32.totalorder %s810_s10, %s1023_s5 }
  0x5a   :  { %p816_p0 = pnand %p814_p13, %p811_p12 }
  0x5c   :  { %819 = shalt.err (!%p816_p0)
}
  0x5d   :  { %s820_s17 = scalar_lea.vmem %s77_s3, 128  ;;  %p825_p2 = scmp.lt.s32.totalorder %s77_s3, %s77_s3 }
  0x5e   :  { %p821_p1 = scmp.ne.s32.totalorder %s77_s3, %s820_s17  ;;  %p826_p3 = scmp.lt.s32.totalorder %s820_s17, %s820_s17 }
  0x60   :  { %p827_p4 = por %p826_p3, %p825_p2 }
  0x62   :  { %p828_p5 = pnand %p827_p4, %p821_p1 }
  0x64   :  { %831 = shalt.err (!%p828_p5)
}
  0x65   :  { %79 = dma.hbm_to_vmem [thread:$0]  %s1023_s5, 128, %s77_s3, [#allocation12]  }
  0x66   :  { %854 = dma.done.wait [#allocation3], 128  }
  0x67   :  { %855 = vsyncadd [#allocation3], 4294967168 }
  0x68   :  { %856 = dma.done.wait [#allocation6], 1280  }
  0x69   :  { %857 = vsyncadd [#allocation6], 4294966016 }
  0x6a   :  { %858 = dma.done.wait [#allocation9], 3120  }
  0x6b   :  { %859 = vsyncadd [#allocation9], 4294964176 }
  0x6c   :  { %860 = dma.done.wait [#allocation12], 128  }
  0x6d   :  { %861 = vsyncadd [#allocation12], 4294967168  ;;  %v872_v0 = vmov 0   ;;  %v873_v1 = vmov 0.0   ;;  %vm874_vm0 = vmmov 0   ;;  %v100_v8 = vld [vmem:[#allocation2] sm:$0xff]  ;;  %v116_v43 = vlaneseq }
  0x6e   :  { %215 = vmatprep.mubr.bf16.mxu0 %v872_v0  ;;  %598 = vmatprep.subr.bf16.mxu1 %v873_v1  ;;  %v646_v2 = vld [vmem:[#allocation7 + $0x4] ss:$12 sps:$4 sm:$0xff]   ;;  %v648_v3 = vld [vmem:[#allocation7] ss:$12 sps:$4 sm:$0xff]   ;;  %v649_v4 = vld [vmem:[#allocation7 + $0x1c] ss:$12 sps:$4 sm:$0xff]   ;;  %v101_v12 = vpack.c.bf16 %v100_v8, %v100_v8 }
  0x6f   :  { %604 = vmatprep.mubr.msk.bf16.mxu1 %vm874_vm0, %v873_v1  ;;  %183 = vmatprep.subr.bf16.mxu0 %v646_v2  ;;  %v651_v5 = vld [vmem:[#allocation7 + $0x18] ss:$12 sps:$4 sm:$0xff]   ;;  %v652_v6 = vld [vmem:[#allocation7 + $0x34] ss:$12 sps:$4 sm:$0xff]   ;;  %v654_v7 = vld [vmem:[#allocation7 + $0x30] ss:$12 sps:$4 sm:$0xff]  }
  0x70   :  { %184 = vmatpush1.bf16.msra.mxu0 %v648_v3  ;;  %v657_v9 = vld [vmem:[#allocation8 + $0x4] ss:$12 sps:$4 sm:$0xff]   ;;  %v664_v10 = vld [vmem:[#allocation7 + $0x8] ss:$12 sps:$4 sm:$0xff]   ;;  %vm179_vm1 = vcmask 392192   ;;  %v117_v44 = vshrl.u32 %v116_v43, 7 }
  0x71   :  { %185 = vmatprep.subr.bf16.mxu0 %v649_v4  ;;  %v655_v11 = vld [vmem:[#allocation8] ss:$12 sps:$4 sm:$0xff]   ;;  %599 = vmatpush3.bf16.msra.mxu1 %v664_v10  ;;  %v668_v13 = vld [vmem:[#allocation7 + $0x20] ss:$12 sps:$4 sm:$0xff]   ;;  %v660_v14 = vld [vmem:[#allocation8 + $0x1c] ss:$12 sps:$4 sm:$0xff]  }
  0x72   :  { %600 = vmatprep.subr.bf16.mxu1 %v873_v1  ;;  %v658_v15 = vld [vmem:[#allocation8 + $0x18] ss:$12 sps:$4 sm:$0xff]   ;;  %v672_v16 = vld [vmem:[#allocation7 + $0x38] ss:$12 sps:$4 sm:$0xff]   ;;  %v663_v17 = vld [vmem:[#allocation8 + $0x34] ss:$12 sps:$4 sm:$0xff]  }
  0x73   :  { %v661_v18 = vld [vmem:[#allocation8 + $0x30] ss:$12 sps:$4 sm:$0xff]   ;;  %v679_v19 = vld [vmem:[#allocation8 + $0x8] ss:$12 sps:$4 sm:$0xff]   ;;  %v667_v20 = vld [vmem:[#allocation8 + $0x4c] ss:$12 sps:$4 sm:$0xff]  }
  0x74   :  { %186 = vmatpush1.bf16.msra.mxu0 %v651_v5  ;;  %v665_v21 = vld [vmem:[#allocation8 + $0x48] ss:$12 sps:$4 sm:$0xff]   ;;  %v683_v22 = vld [vmem:[#allocation8 + $0x20] ss:$12 sps:$4 sm:$0xff]   ;;  %v671_v23 = vld [vmem:[#allocation8 + $0x64] ss:$12 sps:$4 sm:$0xff]  }
  0x75   :  { %187 = vmatprep.subr.bf16.mxu0 %v652_v6  ;;  %601 = vmatpush3.bf16.msra.mxu1 %v668_v13  ;;  %v669_v24 = vld [vmem:[#allocation8 + $0x60] ss:$12 sps:$4 sm:$0xff]   ;;  %v684_v25 = vld [vmem:[#allocation8 + $0x38] ss:$12 sps:$4 sm:$0xff]   ;;  %v675_v26 = vld [vmem:[#allocation8 + $0x7c] ss:$12 sps:$4 sm:$0xff]  }
  0x76   :  { %602 = vmatprep.subr.bf16.mxu1 %v873_v1  ;;  %v673_v27 = vld [vmem:[#allocation8 + $0x78] ss:$12 sps:$4 sm:$0xff]   ;;  %v685_v28 = vld [vmem:[#allocation8 + $0x50] ss:$12 sps:$4 sm:$0xff]   ;;  %v678_v29 = vld [vmem:[#allocation8 + $0x94] ss:$12 sps:$4 sm:$0xff]  }
  0x77   :  { %v676_v30 = vld [vmem:[#allocation8 + $0x90] ss:$12 sps:$4 sm:$0xff]   ;;  %v686_v31 = vld [vmem:[#allocation8 + $0x68] ss:$12 sps:$4 sm:$0xff]   ;;  %v682_v32 = vld [vmem:[#allocation8 + $0xac] ss:$12 sps:$4 sm:$0xff]  }
  0x78   :  { %188 = vmatpush1.bf16.msra.mxu0 %v654_v7  ;;  %v680_v33 = vld [vmem:[#allocation8 + $0xa8] ss:$12 sps:$4 sm:$0xff]   ;;  %v687_v35 = vld [vmem:[#allocation8 + $0x80] ss:$12 sps:$4 sm:$0xff]   ;;  %v688_v37 = vld [vmem:[#allocation8 + $0x98] ss:$12 sps:$4 sm:$0xff]  }
  0x79   :  { %425 = vmatprep.subr.bf16.mxu0 %v657_v9  ;;  %603 = vmatpush3.bf16.msra.mxu1 %v672_v16  ;;  %v99_v34 = vld [vmem:[#allocation5] sm:$0xff]  ;;  %v118_v45 = vsub.s32 0, %v117_v44  ;;  %v114_v46 = vld [vmem:[#allocation10] sm:$0x7]  ;;  %v122_v47 = vsub.s32 1, %v117_v44  ;;  %v520_v2 = vld [vmem:[#allocation11] sm:$0xff] }
  0x7a   :  { %608 = vmatprep.subr.bf16.mxu1 %v873_v1  ;;  %v264_v36 = vpack.c.bf16 %v99_v34, %v99_v34  ;;  %v689_v38 = vld [vmem:[#allocation8 + $0xb0] ss:$12 sps:$4 sm:$0xff]   ;;  %s875_s5 = smov [#allocation13]  }
  0x7b   :  { %557 = vmatmul.mubr.msk.bf16.vlgmr.msra.gmra.mrb[0].mxu0 %vm179_vm1, %v101_v12  ;;  %v119_v48 = vrot.slane %v114_v46, %v118_v45  ;;  %v123_v50 = vrot.slane %v114_v46, %v122_v47  ;;  %s536_s18 = sshll.u32 %s875_s5, 4  ;;  %s537_s18 = int_to_ptr.vmem [resolvable:$true] %s536_s18 }
  0x7c   :  { %426 = vmatpush1.bf16.msra.mxu0 %v655_v11  ;;  %457 = vmatprep.mubr.bf16.mxu0 %v872_v0  ;;  %v126_v0 = vsub.s32 2, %v117_v44  ;;  %s832_s19 = scalar_lea.vmem %s537_s18, 128  ;;  %p837_p7 = scmp.lt.s32.totalorder %s537_s18, %s537_s18 }
  0x7d   :  { %427 = vmatprep.subr.bf16.mxu0 %v660_v14  ;;  %605 = vmatmul.mubr.msk.bf16.vlgmr.msra.gmra.mrb[0].mxu1 %vm179_vm1, %v101_v12  ;;  %p833_p6 = scmp.ne.s32.totalorder %s537_s18, %s832_s19  ;;  %p838_p8 = scmp.lt.s32.totalorder %s832_s19, %s832_s19 }
  0x7e   :  { %609 = vmatpush3.bf16.msra.mxu1 %v679_v19  ;;  %624 = vmatprep.mubr.msk.bf16.mxu1 %vm874_vm0, %v873_v1  ;;  %v127_v3 = vrot.slane %v114_v46, %v126_v0 }
  0x7f   :  { %610 = vmatprep.subr.bf16.mxu1 %v873_v1  ;;  %p839_p9 = por %p838_p8, %p837_p7 }
  0x80   :  { %428 = vmatpush1.bf16.msra.mxu0 %v658_v15 }
  0x81   :  { %429 = vmatprep.subr.bf16.mxu0 %v663_v17  ;;  %p840_p10 = pnand %p839_p9, %p833_p6 }
  0x82   :  { %611 = vmatpush3.bf16.msra.mxu1 %v683_v22 }
  0x83   :  { %612 = vmatprep.subr.bf16.mxu1 %v873_v1 }
  0x84   :  { %430 = vmatpush1.bf16.msra.mxu0 %v661_v18 }
  0x85   :  { %431 = vmatprep.subr.bf16.mxu0 %v667_v20 }
  0x86   :  { %613 = vmatpush3.bf16.msra.mxu1 %v684_v25 }
  0x87   :  { %614 = vmatprep.subr.bf16.mxu1 %v873_v1 }
  0x88   :  { %432 = vmatpush1.bf16.msra.mxu0 %v665_v21 }
  0x89   :  { %433 = vmatprep.subr.bf16.mxu0 %v671_v23 }
  0x8a   :  { %615 = vmatpush3.bf16.msra.mxu1 %v685_v28 }
  0x8b   :  { %616 = vmatprep.subr.bf16.mxu1 %v873_v1 }
  0x8c   :  { %434 = vmatpush1.bf16.msra.mxu0 %v669_v24 }
  0x8d   :  { %435 = vmatprep.subr.bf16.mxu0 %v675_v26 }
  0x8e   :  { %617 = vmatpush3.bf16.msra.mxu1 %v686_v31 }
  0x8f   :  { %618 = vmatprep.subr.bf16.mxu1 %v873_v1 }
  0x90   :  { %436 = vmatpush1.bf16.msra.mxu0 %v673_v27 }
  0x91   :  { %437 = vmatprep.subr.bf16.mxu0 %v678_v29 }
  0x92   :  { %619 = vmatpush3.bf16.msra.mxu1 %v687_v35 }
  0x93   :  { %620 = vmatprep.subr.bf16.mxu1 %v873_v1 }
  0x94   :  { %438 = vmatpush1.bf16.msra.mxu0 %v676_v30 }
  0x95   :  { %439 = vmatprep.subr.bf16.mxu0 %v682_v32 }
  0x96   :  { %621 = vmatpush3.bf16.msra.mxu1 %v688_v37 }
  0x97   :  { %622 = vmatprep.subr.bf16.mxu1 %v873_v1 }
  0x98   :  { %440 = vmatpush1.bf16.msra.mxu0 %v680_v33 }
  0x9a   :  { %623 = vmatpush3.bf16.msra.mxu1 %v689_v38 }
  0x9b   :  { %458 = vmatmul.mubr.bf16.vlgmr.msra.gmra.mrb[0].mxu0 %v264_v36 }
  0x9d   :  { %625 = vmatmul.mubr.bf16.vlgmr.msra.gmra.mrb[4].mxu1 %v264_v36 }
 0x150   :  { %v258_v39 = vpop.f32.mrb[0].mxu1 }
 0x151   :  { %v606_v40 = vpop.f32.mrb[1].mxu1  ;;  %v259_v7 = vadd.f32 %v258_v39, %v127_v3 }
 0x152   :  { %v261_v41 = vpop.f32.mrb[2].mxu1 }
 0x153   :  { %v607_v42 = vpop.f32.mrb[3].mxu1 }
 0x16e   :  { %v459_v49 = vpop.f32.mrb[0].mxu0 }
 0x16f   :  { %v628_v51 = vadd.f32 %v459_v49, %v119_v48  ;;  %v461_v52 = vpop.f32.mrb[1].mxu0 }
 0x170   :  { %v463_v53 = vpop.f32.mrb[2].mxu0  ;;  %v629_v56 = vadd.f32 %v461_v52, %v123_v50  ;;  %v500_v58 = vpop.f32.mrb[4].mxu1 }
 0x171   :  { %v583_v54 = vmul.f32 -1.442695, %v628_v51  ;;  %v464_v55 = vpop.f32.mrb[3].mxu0  ;;  %v626_v59 = vpop.f32.mrb[5].mxu1  ;;  %v521_v5 = vadd.f32 %v520_v2, %v500_v58 }
 0x172   :  { %v584_v57 = vmul.f32 -1.442695, %v629_v56  ;;  %v503_v60 = vpop.f32.mrb[6].mxu1 }
 0x173   :  { %690 = vpow2.f32 %v583_v54  ;;  %v627_v61 = vpop.f32.mrb[7].mxu1 }
 0x174   :  { %692 = vpow2.f32 %v584_v57 }
 0x17d   :  { %v691_v62 = vpop.eup %690 }
 0x17e   :  { %v510_v63 = vadd.f32 1.0, %v691_v62  ;;  %v693_v1 = vpop.eup %692 }
 0x17f   :  { %v517_v4 = vadd.f32 1.0, %v693_v1 }
 0x180   :  { %694 = vrcp.f32 %v510_v63 }
 0x181   :  { %696 = vrcp.f32 %v517_v4 }
 0x18a   :  { %v695_v6 = vpop.eup %694 }
 0x18b   :  { %v522_v8 = vmul.f32 %v695_v6, %v521_v5  ;;  %v697_v10 = vpop.eup %696 }
 0x18c   :  { %v525_v11 = vsub.f32 1.0, %v697_v10  ;;  %v527_v14 = vmul.f32 %v697_v10, %v99_v34 }
 0x18d   :  { %v523_v9 = vadd.f32 %v522_v8, %v259_v7 }
 0x18f   :  { %698 = vtanh.f32 %v523_v9 }
 0x199   :  { %v699_v12 = vpop.eup %698 }
 0x19a   :  { %v526_v13 = vmul.f32 %v699_v12, %v525_v11 }
 0x19c   :  { %v528_v15 = vadd.f32 %v527_v14, %v526_v13 }
 0x19e   :  { %529 = vst [vmem:[#allocation13] sm:$0xff] %v528_v15 }
 0x19f   :  { %843 = shalt.err (!%p840_p10)
}
 0x1a0   :  { %s844_s12 = scalar_lea.hbm %s1024_s6, 128 }
 0x1a1   :  { %p845_p11 = scmp.ne.s32.totalorder %s1024_s6, %s844_s12  ;;  %p848_p12 = scmp.lt.u32.totalorder %s844_s12, %s1024_s6 }
 0x1a3   :  { %p850_p13 = pnand %p848_p12, %p845_p11 }
 0x1a5   :  { %853 = shalt.err (!%p850_p13)
}
 0x1a6   :  { %539 = dma.vmem_to_hbm [thread:$0]  %s537_s18, 128, %s1024_s6, [#allocation4]  }
 0x1a7   :  { %862 = dma.done.wait [#allocation4], 128  }
 0x1a8   :  { %863 = vsyncadd [#allocation4], 4294967168 }
 0x1a9   :  { %543 = vsyncpa [#allocation3], 1 }
 0x1aa   :  { %544 = vsyncpa [#allocation6], 1 }
 0x1ab   :  { %545 = vsyncpa [#allocation9], 1 }
 0x1ac   :  { %546 = vsyncpa [#allocation12], 1 }
 0x1ad   :  { %547 = vsyncpa [#allocation4], 1 }

</bundles_post_ra>
